<compile_context>
chip_gen: v5e
topology: v5e:2x2
jax: 0.10.0
libtpu: 0.0.40
codegen_flags: <defaults>
</compile_context>

<pallas_src>
import functools

import jax
import jax.numpy as jnp
from jax import lax
from jax.experimental import pallas as pl
from jax.experimental.pallas import tpu as pltpu


# ---------------------------------------------------------------------------
# helpers
# ---------------------------------------------------------------------------
def _round_up(x, m):
    return ((x + m - 1) // m) * m


def _layernorm_padded(x, gamma, beta, n_real, eps):
    # Single-pass BertLayerNorm over a lane-padded slab: padded lanes of x are
    # exactly 0 (zero-padded weights/biases), so summing over all lanes and
    # dividing by the true hidden size gives the exact per-row statistics.
    inv_n = jnp.float32(1.0 / n_real)
    s1 = jnp.sum(x, axis=-1, keepdims=True) * inv_n            # E[x]
    s2 = jnp.sum(x * x, axis=-1, keepdims=True) * inv_n        # E[x^2]
    var = s2 - s1 * s1                                         # biased variance
    xn = (x - s1) * lax.rsqrt(var + eps)                       # EUP rsqrt (free slot)
    return xn * gamma + beta                                   # padded lanes -> 0


def _layernorm_ref(x, gamma, beta, eps):
    u = jnp.mean(x, axis=-1, keepdims=True)
    s = jnp.mean((x - u) * (x - u), axis=-1, keepdims=True)
    return (x - u) * lax.rsqrt(s + eps) * gamma + beta


# ---------------------------------------------------------------------------
# Fused kernel: VisualFeatEncoder (CLS rows only) -> BertPooler
# ---------------------------------------------------------------------------
def vqa_cls_pooler_kernel(feat_ref, pos_ref,
                          wv_ref, bv_ref, gv_ref, bev_ref,
                          wb_ref, bb_ref, gb_ref, beb_ref,
                          wp_ref, bp_ref,
                          pooled_ref, *, hid):
    # ---- VisualFeatEncoder: feat branch (MXU, bf16 operands, f32 accum) ----
    x = jnp.dot(feat_ref[...], wv_ref[...],
                preferred_element_type=jnp.float32) + bv_ref[...]
    x = _layernorm_padded(x, gv_ref[...], bev_ref[...], hid, 1e-12)

    # ---- VisualFeatEncoder: box branch (K=4 -> 4 VPU broadcast-FMAs) ----
    pos = pos_ref[...]                 # (tb, 4) f32
    wb = wb_ref[...]                   # (4, hid_pad) f32
    y = bb_ref[...]                    # (1, hid_pad)
    for k in range(4):                 # static unroll, stays in vector-ALU slots
        y = y + pos[:, k:k + 1] * wb[k:k + 1, :]
    y = _layernorm_padded(y, gb_ref[...], beb_ref[...], hid, 1e-12)

    visn_cls = (x + y) * 0.5           # (tb, hid_pad) f32, padded lanes == 0

    # ---- BertPooler: tanh(Linear), lane-dense padded slab -> unmasked store ----
    pooled = jnp.tanh(
        jnp.dot(visn_cls.astype(jnp.bfloat16), wp_ref[...],
                preferred_element_type=jnp.float32) + bp_ref[...])
    pooled_ref[...] = pooled


def _vmem_budget_bytes(tb, f, hid_pad):
    moving = 2 * (tb * f * 2 + tb * 4 * 4 + tb * hid_pad * 4)     # double-buffered feat/pos/out
    resident = (f * hid_pad * 2 + 4 * hid_pad * 4                 # wv(bf16), wb(f32)
                + hid_pad * hid_pad * 2 + 8 * hid_pad * 4)        # wp(bf16), biases/LN params
    scratch = 6 * tb * hid_pad * 4                                # f32 intermediates
    return moving + 2 * resident + scratch


def vqa_forward(feat, pos, params, *, hid_dim):
    b, o, f = feat.shape
    hid_pad = params["wp"].shape[1]

    # Only the CLS-like (first-object) row of each image reaches the pooler ->
    # feed just those rows to the kernel.
    feat_cls = feat[:, 0, :].astype(jnp.bfloat16)                 # (b, f) bf16 at the boundary
    pos_cls = pos[:, 0, :].astype(jnp.float32)                    # (b, 4)

    # Row tiling: 256-row tiles for large batches, 8-row minimum for alignment.
    tb = min(256, _round_up(max(b, 8), 8))
    pad_b = _round_up(b, tb)
    if pad_b != b:
        feat_cls = jnp.pad(feat_cls, ((0, pad_b - b), (0, 0)))
        pos_cls = jnp.pad(pos_cls, ((0, pad_b - b), (0, 0)))

    args = (feat_cls, pos_cls,
            params["wv"], params["bv"], params["gv"], params["bev"],
            params["wb"], params["bb"], params["gb"], params["beb"],
            params["wp"], params["bp"])

    def row_spec(last):
        return pl.BlockSpec((tb, last), lambda i: (i, 0))

    def const_spec(shape):
        return pl.BlockSpec(shape, lambda i: (0, 0))              # VMEM-resident weights

    in_specs = [
        row_spec(f),                      # feat_cls (moving)
        row_spec(4),                      # pos_cls  (moving)
        const_spec(params["wv"].shape),
        const_spec(params["bv"].shape),
        const_spec(params["gv"].shape),
        const_spec(params["bev"].shape),
        const_spec(params["wb"].shape),
        const_spec(params["bb"].shape),
        const_spec(params["gb"].shape),
        const_spec(params["beb"].shape),
        const_spec(params["wp"].shape),
        const_spec(params["bp"].shape),
    ]

    vmem_bytes = int(min(max(2 * _vmem_budget_bytes(tb, f, hid_pad), 4 << 20), 28 << 20))

    pooled_pad = pl.pallas_call(
        functools.partial(vqa_cls_pooler_kernel, hid=hid_dim),
        out_shape=jax.ShapeDtypeStruct((pad_b, hid_pad), jnp.float32),
        grid=(pad_b // tb,),
        in_specs=in_specs,
        out_specs=row_spec(hid_pad),
        compiler_params=pltpu.CompilerParams(
            dimension_semantics=("parallel",),        # shards rows across v7x's 2 TCs
            vmem_limit_bytes=vmem_bytes),
        # TODO(synk): if the feat DMA is still exposed on v5e at real LXMERT
        # sizes, bump the feat BlockSpec to pipeline_mode=pl.Buffered(3).
    )(*args)

    return pooled_pad[:b, :hid_dim]


# ---------------------------------------------------------------------------
# VQAModel wrapper
# ---------------------------------------------------------------------------
class VQAModelPallas:
    def __init__(self, num_answers, hid_dim=32, feat_dim=32, key=None):
        self.num_answers = num_answers
        self.hid_dim = hid_dim
        self.feat_dim = feat_dim
        key = jax.random.PRNGKey(42) if key is None else key
        ks = jax.random.split(key, 8)
        std = 0.02  # init_bert_weights: normal(0, 0.02), biases 0, LN gamma=1 beta=0

        def nrm(k, shape):
            return (std * jax.random.normal(k, shape)).astype(jnp.float32)

        h, h2 = hid_dim, hid_dim * 2
        hid_pad = _round_up(max(h, 128), 128)      # lane-dense hidden slab

        def pad_cols_bf16(w, rows, cols):
            out = jnp.zeros((rows, cols), jnp.bfloat16)
            return out.at[:w.shape[0], :w.shape[1]].set(w.astype(jnp.bfloat16))

        def pad_cols_f32(w, rows, cols):
            out = jnp.zeros((rows, cols), jnp.float32)
            return out.at[:w.shape[0], :w.shape[1]].set(w)

        wv = nrm(ks[0], (feat_dim, h))
        wb = nrm(ks[1], (4, h))
        wp = nrm(ks[2], (h, h))

        self.params = {
            # VisualFeatEncoder feat branch (bf16 weight for the MXU), lane-padded
            "wv": pad_cols_bf16(wv, feat_dim, hid_pad),
            "bv": jnp.zeros((1, hid_pad), jnp.float32),
            "gv": pad_cols_f32(jnp.ones((1, h), jnp.float32), 1, hid_pad),
            "bev": jnp.zeros((1, hid_pad), jnp.float32),
            # box branch stays f32 (VPU FMA path), lane-padded
            "wb": pad_cols_f32(wb, 4, hid_pad),
            "bb": jnp.zeros((1, hid_pad), jnp.float32),
            "gb": pad_cols_f32(jnp.ones((1, h), jnp.float32), 1, hid_pad),
            "beb": jnp.zeros((1, hid_pad), jnp.float32),
            # BertPooler, lane/sublane-padded bf16
            "wp": pad_cols_bf16(wp, hid_pad, hid_pad),
            "bp": jnp.zeros((1, hid_pad), jnp.float32),
        }

        # logit_fc parameters kept for module parity; forward() returns
        # pooled_output so the logit head is dead code and is skipped (perf).
        self.logit_fc_params = {
            "w1": nrm(ks[3], (h, h2)), "b1": jnp.zeros((1, h2), jnp.float32),
            "g": jnp.ones((1, h2), jnp.float32), "be": jnp.zeros((1, h2), jnp.float32),
            "w2": nrm(ks[4], (h2, num_answers)),
            "b2": jnp.zeros((1, num_answers), jnp.float32),
        }

    def forward(self, feat, pos, sent=None, tags=None):
        """
        feat: (b, o, f) float32 visual features
        pos:  (b, o, 4) float32 boxes
        sent/tags: unused here (TODO(synk): tokenizer + full LXRT encoder)
        returns pooled_output: (b, hid_dim)  -- matches the original forward()
        """
        return vqa_forward(feat, pos, self.params, hid_dim=self.hid_dim)

    # Pure-JAX f32 reference of the same simplified forward (for checking).
    def forward_ref(self, feat, pos):
        h = self.hid_dim
        p = self.params
        f_cls = feat[:, 0, :].astype(jnp.float32)
        pos_cls = pos[:, 0, :].astype(jnp.float32)
        x = f_cls @ p["wv"][:, :h].astype(jnp.float32) + p["bv"][:, :h]
        x = _layernorm_ref(x, p["gv"][:, :h], p["bev"][:, :h], 1e-12)
        y = pos_cls @ p["wb"][:, :h] + p["bb"][:, :h]
        y = _layernorm_ref(y, p["gb"][:, :h], p["beb"][:, :h], 1e-12)
        visn = (x + y) * 0.5
        pooled = jnp.tanh(visn @ p["wp"][:h, :h].astype(jnp.float32) + p["bp"][:, :h])
        return pooled


# ---------------------------------------------------------------------------
if __name__ == "__main__":
    key = jax.random.PRNGKey(0)
    k1, k2 = jax.random.split(key)

    b, o, f = 2, 8, 32        # batch, objects, visual feature size
    hid_dim = 32
    num_answers = 16

    feat = jax.random.normal(k1, (b, o, f), dtype=jnp.float32)
    pos = jax.random.uniform(k2, (b, o, 4), dtype=jnp.float32)

    model = VQAModelPallas(num_answers=num_answers, hid_dim=hid_dim, feat_dim=f)
    pooled = model.forward(feat, pos, sent=["dummy"] * b, tags=[[]] * b)
    pooled = jax.block_until_ready(pooled)

    assert pooled.shape == (b, hid_dim)
    assert bool(jnp.all(jnp.isfinite(pooled)))

    # Loose tolerance: kernel uses bf16 feat/weights on the MXU with f32 accum.
    ref = model.forward_ref(feat, pos)
    assert bool(jnp.all(jnp.abs(pooled - ref) < 5e-2))

    print("KERNEL_OK")
</pallas_src>

<mosaic_0001>
module attributes {stable_mosaic.version = 11 : i64} {
  func.func @vqa_cls_pooler_kernel(%arg0: i32, %arg1: memref<8x32xbf16, #tpu.memory_space<vmem>>, %arg2: memref<8x4xf32, #tpu.memory_space<vmem>>, %arg3: memref<32x128xbf16, #tpu.memory_space<vmem>>, %arg4: memref<1x128xf32, #tpu.memory_space<vmem>>, %arg5: memref<1x128xf32, #tpu.memory_space<vmem>>, %arg6: memref<1x128xf32, #tpu.memory_space<vmem>>, %arg7: memref<4x128xf32, #tpu.memory_space<vmem>>, %arg8: memref<1x128xf32, #tpu.memory_space<vmem>>, %arg9: memref<1x128xf32, #tpu.memory_space<vmem>>, %arg10: memref<1x128xf32, #tpu.memory_space<vmem>>, %arg11: memref<128x128xbf16, #tpu.memory_space<vmem>>, %arg12: memref<1x128xf32, #tpu.memory_space<vmem>>, %arg13: memref<8x128xf32, #tpu.memory_space<vmem>>) attributes {dimension_semantics = [#tpu.dimension_semantics<parallel>], iteration_bounds = array<i64: 1>, scalar_prefetch = 0 : i64, scratch_operands = 0 : i64, tpu.core_type = #tpu.core_type<tc>, window_params = [{transform_indices = @transform_0, window_bounds = array<i64: 8, 32>}, {transform_indices = @transform_1, window_bounds = array<i64: 8, 4>}, {pipeline_mode = #tpu.pipeline_mode<synchronous>, transform_indices = @transform_2, window_bounds = array<i64: 32, 128>}, {pipeline_mode = #tpu.pipeline_mode<synchronous>, transform_indices = @transform_3, window_bounds = array<i64: 1, 128>}, {pipeline_mode = #tpu.pipeline_mode<synchronous>, transform_indices = @transform_4, window_bounds = array<i64: 1, 128>}, {pipeline_mode = #tpu.pipeline_mode<synchronous>, transform_indices = @transform_5, window_bounds = array<i64: 1, 128>}, {pipeline_mode = #tpu.pipeline_mode<synchronous>, transform_indices = @transform_6, window_bounds = array<i64: 4, 128>}, {pipeline_mode = #tpu.pipeline_mode<synchronous>, transform_indices = @transform_7, window_bounds = array<i64: 1, 128>}, {pipeline_mode = #tpu.pipeline_mode<synchronous>, transform_indices = @transform_8, window_bounds = array<i64: 1, 128>}, {pipeline_mode = #tpu.pipeline_mode<synchronous>, transform_indices = @transform_9, window_bounds = array<i64: 1, 128>}, {pipeline_mode = #tpu.pipeline_mode<synchronous>, transform_indices = @transform_10, window_bounds = array<i64: 128, 128>}, {pipeline_mode = #tpu.pipeline_mode<synchronous>, transform_indices = @transform_11, window_bounds = array<i64: 1, 128>}, {transform_indices = @transform_12, window_bounds = array<i64: 8, 128>}]} {
    %c0 = arith.constant 0 : index
    %c0_0 = arith.constant 0 : index
    %0 = vector.load %arg1[%c0, %c0_0] : memref<8x32xbf16, #tpu.memory_space<vmem>>, vector<8x32xbf16>
    %c0_1 = arith.constant 0 : index
    %c0_2 = arith.constant 0 : index
    %1 = vector.load %arg3[%c0_1, %c0_2] : memref<32x128xbf16, #tpu.memory_space<vmem>>, vector<32x128xbf16>
    %cst = arith.constant dense<0.000000e+00> : vector<8x128xf32>
    %2 = tpu.matmul %0, %1, %cst {dimension_numbers = #tpu.dot_dimension_numbers<[1], [0], [0], [1], [0, 0, 1, 1], [], []>} : vector<8x32xbf16>, vector<32x128xbf16>, vector<8x128xf32> -> vector<8x128xf32>
    %c0_3 = arith.constant 0 : index
    %c0_4 = arith.constant 0 : index
    %3 = vector.load %arg4[%c0_3, %c0_4] : memref<1x128xf32, #tpu.memory_space<vmem>>, vector<1x128xf32>
    %4 = vector.broadcast %3 : vector<1x128xf32> to vector<8x128xf32>
    %5 = arith.addf %2, %4 : vector<8x128xf32>
    %c0_5 = arith.constant 0 : index
    %c0_6 = arith.constant 0 : index
    %6 = vector.load %arg5[%c0_5, %c0_6] : memref<1x128xf32, #tpu.memory_space<vmem>>, vector<1x128xf32>
    %c0_7 = arith.constant 0 : index
    %c0_8 = arith.constant 0 : index
    %7 = vector.load %arg6[%c0_7, %c0_8] : memref<1x128xf32, #tpu.memory_space<vmem>>, vector<1x128xf32>
    %cst_9 = arith.constant dense<0.000000e+00> : vector<8xf32>
    %8 = vector.multi_reduction <add>, %5, %cst_9 [1] : vector<8x128xf32> to vector<8xf32>
    %9 = vector.shape_cast %8 : vector<8xf32> to vector<8x1xf32>
    %cst_10 = arith.constant 3.125000e-02 : f32
    %10 = vector.broadcast %cst_10 : f32 to vector<8x1xf32>
    %11 = arith.mulf %9, %10 : vector<8x1xf32>
    %12 = arith.mulf %5, %5 : vector<8x128xf32>
    %cst_11 = arith.constant dense<0.000000e+00> : vector<8xf32>
    %13 = vector.multi_reduction <add>, %12, %cst_11 [1] : vector<8x128xf32> to vector<8xf32>
    %14 = vector.shape_cast %13 : vector<8xf32> to vector<8x1xf32>
    %cst_12 = arith.constant 3.125000e-02 : f32
    %15 = vector.broadcast %cst_12 : f32 to vector<8x1xf32>
    %16 = arith.mulf %14, %15 : vector<8x1xf32>
    %17 = arith.mulf %11, %11 : vector<8x1xf32>
    %18 = arith.subf %16, %17 : vector<8x1xf32>
    %19 = vector.broadcast %11 : vector<8x1xf32> to vector<8x128xf32>
    %20 = arith.subf %5, %19 : vector<8x128xf32>
    %cst_13 = arith.constant 9.99999996E-13 : f32
    %21 = vector.broadcast %cst_13 : f32 to vector<8x1xf32>
    %22 = arith.addf %18, %21 : vector<8x1xf32>
    %23 = math.rsqrt %22 : vector<8x1xf32>
    %24 = vector.broadcast %23 : vector<8x1xf32> to vector<8x128xf32>
    %25 = arith.mulf %20, %24 : vector<8x128xf32>
    %26 = vector.broadcast %6 : vector<1x128xf32> to vector<8x128xf32>
    %27 = arith.mulf %25, %26 : vector<8x128xf32>
    %28 = vector.broadcast %7 : vector<1x128xf32> to vector<8x128xf32>
    %29 = arith.addf %27, %28 : vector<8x128xf32>
    %c0_14 = arith.constant 0 : index
    %c0_15 = arith.constant 0 : index
    %30 = vector.load %arg2[%c0_14, %c0_15] : memref<8x4xf32, #tpu.memory_space<vmem>>, vector<8x4xf32>
    %c0_16 = arith.constant 0 : index
    %c0_17 = arith.constant 0 : index
    %31 = vector.load %arg7[%c0_16, %c0_17] : memref<4x128xf32, #tpu.memory_space<vmem>>, vector<4x128xf32>
    %c0_18 = arith.constant 0 : index
    %c0_19 = arith.constant 0 : index
    %32 = vector.load %arg8[%c0_18, %c0_19] : memref<1x128xf32, #tpu.memory_space<vmem>>, vector<1x128xf32>
    %33 = vector.extract_strided_slice %30 {offsets = [0, 0], sizes = [8, 1], strides = [1, 1]} : vector<8x4xf32> to vector<8x1xf32>
    %34 = vector.extract_strided_slice %31 {offsets = [0, 0], sizes = [1, 128], strides = [1, 1]} : vector<4x128xf32> to vector<1x128xf32>
    %35 = vector.broadcast %33 : vector<8x1xf32> to vector<8x128xf32>
    %36 = vector.broadcast %34 : vector<1x128xf32> to vector<8x128xf32>
    %37 = arith.mulf %35, %36 : vector<8x128xf32>
    %38 = vector.broadcast %32 : vector<1x128xf32> to vector<8x128xf32>
    %39 = arith.addf %38, %37 : vector<8x128xf32>
    %40 = vector.extract_strided_slice %30 {offsets = [0, 1], sizes = [8, 1], strides = [1, 1]} : vector<8x4xf32> to vector<8x1xf32>
    %41 = vector.extract_strided_slice %31 {offsets = [1, 0], sizes = [1, 128], strides = [1, 1]} : vector<4x128xf32> to vector<1x128xf32>
    %42 = vector.broadcast %40 : vector<8x1xf32> to vector<8x128xf32>
    %43 = vector.broadcast %41 : vector<1x128xf32> to vector<8x128xf32>
    %44 = arith.mulf %42, %43 : vector<8x128xf32>
    %45 = arith.addf %39, %44 : vector<8x128xf32>
    %46 = vector.extract_strided_slice %30 {offsets = [0, 2], sizes = [8, 1], strides = [1, 1]} : vector<8x4xf32> to vector<8x1xf32>
    %47 = vector.extract_strided_slice %31 {offsets = [2, 0], sizes = [1, 128], strides = [1, 1]} : vector<4x128xf32> to vector<1x128xf32>
    %48 = vector.broadcast %46 : vector<8x1xf32> to vector<8x128xf32>
    %49 = vector.broadcast %47 : vector<1x128xf32> to vector<8x128xf32>
    %50 = arith.mulf %48, %49 : vector<8x128xf32>
    %51 = arith.addf %45, %50 : vector<8x128xf32>
    %52 = vector.extract_strided_slice %30 {offsets = [0, 3], sizes = [8, 1], strides = [1, 1]} : vector<8x4xf32> to vector<8x1xf32>
    %53 = vector.extract_strided_slice %31 {offsets = [3, 0], sizes = [1, 128], strides = [1, 1]} : vector<4x128xf32> to vector<1x128xf32>
    %54 = vector.broadcast %52 : vector<8x1xf32> to vector<8x128xf32>
    %55 = vector.broadcast %53 : vector<1x128xf32> to vector<8x128xf32>
    %56 = arith.mulf %54, %55 : vector<8x128xf32>
    %57 = arith.addf %51, %56 : vector<8x128xf32>
    %c0_20 = arith.constant 0 : index
    %c0_21 = arith.constant 0 : index
    %58 = vector.load %arg9[%c0_20, %c0_21] : memref<1x128xf32, #tpu.memory_space<vmem>>, vector<1x128xf32>
    %c0_22 = arith.constant 0 : index
    %c0_23 = arith.constant 0 : index
    %59 = vector.load %arg10[%c0_22, %c0_23] : memref<1x128xf32, #tpu.memory_space<vmem>>, vector<1x128xf32>
    %cst_24 = arith.constant dense<0.000000e+00> : vector<8xf32>
    %60 = vector.multi_reduction <add>, %57, %cst_24 [1] : vector<8x128xf32> to vector<8xf32>
    %61 = vector.shape_cast %60 : vector<8xf32> to vector<8x1xf32>
    %cst_25 = arith.constant 3.125000e-02 : f32
    %62 = vector.broadcast %cst_25 : f32 to vector<8x1xf32>
    %63 = arith.mulf %61, %62 : vector<8x1xf32>
    %64 = arith.mulf %57, %57 : vector<8x128xf32>
    %cst_26 = arith.constant dense<0.000000e+00> : vector<8xf32>
    %65 = vector.multi_reduction <add>, %64, %cst_26 [1] : vector<8x128xf32> to vector<8xf32>
    %66 = vector.shape_cast %65 : vector<8xf32> to vector<8x1xf32>
    %cst_27 = arith.constant 3.125000e-02 : f32
    %67 = vector.broadcast %cst_27 : f32 to vector<8x1xf32>
    %68 = arith.mulf %66, %67 : vector<8x1xf32>
    %69 = arith.mulf %63, %63 : vector<8x1xf32>
    %70 = arith.subf %68, %69 : vector<8x1xf32>
    %71 = vector.broadcast %63 : vector<8x1xf32> to vector<8x128xf32>
    %72 = arith.subf %57, %71 : vector<8x128xf32>
    %cst_28 = arith.constant 9.99999996E-13 : f32
    %73 = vector.broadcast %cst_28 : f32 to vector<8x1xf32>
    %74 = arith.addf %70, %73 : vector<8x1xf32>
    %75 = math.rsqrt %74 : vector<8x1xf32>
    %76 = vector.broadcast %75 : vector<8x1xf32> to vector<8x128xf32>
    %77 = arith.mulf %72, %76 : vector<8x128xf32>
    %78 = vector.broadcast %58 : vector<1x128xf32> to vector<8x128xf32>
    %79 = arith.mulf %77, %78 : vector<8x128xf32>
    %80 = vector.broadcast %59 : vector<1x128xf32> to vector<8x128xf32>
    %81 = arith.addf %79, %80 : vector<8x128xf32>
    %82 = arith.addf %29, %81 : vector<8x128xf32>
    %cst_29 = arith.constant 5.000000e-01 : f32
    %83 = vector.broadcast %cst_29 : f32 to vector<8x128xf32>
    %84 = arith.mulf %82, %83 : vector<8x128xf32>
    %85 = arith.truncf %84 : vector<8x128xf32> to vector<8x128xbf16>
    %c0_30 = arith.constant 0 : index
    %c0_31 = arith.constant 0 : index
    %86 = vector.load %arg11[%c0_30, %c0_31] : memref<128x128xbf16, #tpu.memory_space<vmem>>, vector<128x128xbf16>
    %cst_32 = arith.constant dense<0.000000e+00> : vector<8x128xf32>
    %87 = tpu.matmul %85, %86, %cst_32 {dimension_numbers = #tpu.dot_dimension_numbers<[1], [0], [0], [1], [0, 0, 1, 1], [], []>} : vector<8x128xbf16>, vector<128x128xbf16>, vector<8x128xf32> -> vector<8x128xf32>
    %c0_33 = arith.constant 0 : index
    %c0_34 = arith.constant 0 : index
    %88 = vector.load %arg12[%c0_33, %c0_34] : memref<1x128xf32, #tpu.memory_space<vmem>>, vector<1x128xf32>
    %89 = vector.broadcast %88 : vector<1x128xf32> to vector<8x128xf32>
    %90 = arith.addf %87, %89 : vector<8x128xf32>
    %91 = math.tanh %90 : vector<8x128xf32>
    %c0_35 = arith.constant 0 : index
    %c0_36 = arith.constant 0 : index
    %92 = vector.load %arg13[%c0_35, %c0_36] : memref<8x128xf32, #tpu.memory_space<vmem>>, vector<8x128xf32>
    tpu.vector_store %arg13[%c0_35, %c0_36], %91 {strides = array<i32>} : memref<8x128xf32, #tpu.memory_space<vmem>>, vector<8x128xf32>,
    return
  }
  func.func @transform_0(%arg0: i32) -> (i32, i32) {
    %c0_i32 = arith.constant 0 : i32
    %c0_i32_0 = arith.constant 0 : i32
    return %arg0, %c0_i32 : i32, i32
  }
  func.func @transform_1(%arg0: i32) -> (i32, i32) {
    %c0_i32 = arith.constant 0 : i32
    %c0_i32_0 = arith.constant 0 : i32
    return %arg0, %c0_i32 : i32, i32
  }
  func.func @transform_2(%arg0: i32) -> (i32, i32) {
    %c0_i32 = arith.constant 0 : i32
    %c0_i32_0 = arith.constant 0 : i32
    %c0_i32_1 = arith.constant 0 : i32
    return %c0_i32, %c0_i32_0 : i32, i32
  }
  func.func @transform_3(%arg0: i32) -> (i32, i32) {
    %c0_i32 = arith.constant 0 : i32
    %c0_i32_0 = arith.constant 0 : i32
    %c0_i32_1 = arith.constant 0 : i32
    return %c0_i32, %c0_i32_0 : i32, i32
  }
  func.func @transform_4(%arg0: i32) -> (i32, i32) {
    %c0_i32 = arith.constant 0 : i32
    %c0_i32_0 = arith.constant 0 : i32
    %c0_i32_1 = arith.constant 0 : i32
    return %c0_i32, %c0_i32_0 : i32, i32
  }
  func.func @transform_5(%arg0: i32) -> (i32, i32) {
    %c0_i32 = arith.constant 0 : i32
    %c0_i32_0 = arith.constant 0 : i32
    %c0_i32_1 = arith.constant 0 : i32
    return %c0_i32, %c0_i32_0 : i32, i32
  }
  func.func @transform_6(%arg0: i32) -> (i32, i32) {
    %c0_i32 = arith.constant 0 : i32
    %c0_i32_0 = arith.constant 0 : i32
    %c0_i32_1 = arith.constant 0 : i32
    return %c0_i32, %c0_i32_0 : i32, i32
  }
  func.func @transform_7(%arg0: i32) -> (i32, i32) {
    %c0_i32 = arith.constant 0 : i32
    %c0_i32_0 = arith.constant 0 : i32
    %c0_i32_1 = arith.constant 0 : i32
    return %c0_i32, %c0_i32_0 : i32, i32
  }
  func.func @transform_8(%arg0: i32) -> (i32, i32) {
    %c0_i32 = arith.constant 0 : i32
    %c0_i32_0 = arith.constant 0 : i32
    %c0_i32_1 = arith.constant 0 : i32
    return %c0_i32, %c0_i32_0 : i32, i32
  }
  func.func @transform_9(%arg0: i32) -> (i32, i32) {
    %c0_i32 = arith.constant 0 : i32
    %c0_i32_0 = arith.constant 0 : i32
    %c0_i32_1 = arith.constant 0 : i32
    return %c0_i32, %c0_i32_0 : i32, i32
  }
  func.func @transform_10(%arg0: i32) -> (i32, i32) {
    %c0_i32 = arith.constant 0 : i32
    %c0_i32_0 = arith.constant 0 : i32
    %c0_i32_1 = arith.constant 0 : i32
    return %c0_i32, %c0_i32_0 : i32, i32
  }
  func.func @transform_11(%arg0: i32) -> (i32, i32) {
    %c0_i32 = arith.constant 0 : i32
    %c0_i32_0 = arith.constant 0 : i32
    %c0_i32_1 = arith.constant 0 : i32
    return %c0_i32, %c0_i32_0 : i32, i32
  }
  func.func @transform_12(%arg0: i32) -> (i32, i32) {
    %c0_i32 = arith.constant 0 : i32
    %c0_i32_0 = arith.constant 0 : i32
    return %arg0, %c0_i32 : i32, i32
  }
}

</mosaic_0001>

<bundles_post_ra>
// kernel: tpu_custom_call.1
= control target key start
LH: loop header
LB: loop body
LE: loop exit
PB: predicated region body
PF: predicated region fallthrough
CT: control target
= control target key end

     0   :  { %17 = vsyncpa [#allocation3], 0  ;;  %s591_s0 = inlined_call_operand.vmem [shape: bf16[8,32], index: 0, kind: input, shape index: {}]   ;;  %s592_s1 = inlined_call_operand.vmem [shape: f32[8,4], index: 1, kind: input, shape index: {}]   ;;  %s593_s2 = inlined_call_operand.hbm [shape: bf16[32,128], index: 2, kind: input, shape index: {}]   ;;  %s594_s3 = inlined_call_operand.vmem [shape: f32[1,128], index: 3, kind: input, shape index: {}]   ;;  %s595_s4 = inlined_call_operand.vmem [shape: f32[1,128], index: 4, kind: input, shape index: {}]   ;;  %s596_s5 = inlined_call_operand.vmem [shape: f32[1,128], index: 5, kind: input, shape index: {}]   ;;  %s597_s6 = inlined_call_operand.vmem [shape: f32[4,128], index: 6, kind: input, shape index: {}]   ;;  %s598_s7 = inlined_call_operand.vmem [shape: f32[1,128], index: 7, kind: input, shape index: {}]   ;;  %s599_s8 = inlined_call_operand.vmem [shape: f32[1,128], index: 8, kind: input, shape index: {}]   ;;  %s600_s9 = inlined_call_operand.vmem [shape: f32[1,128], index: 9, kind: input, shape index: {}]   ;;  %s601_s10 = inlined_call_operand.hbm [shape: bf16[128,128], index: 10, kind: input, shape index: {}]   ;;  %s602_s11 = inlined_call_operand.vmem [shape: f32[1,128], index: 11, kind: input, shape index: {}]   ;;  %s603_s12 = inlined_call_operand.hbm [shape: f32[8,128], index: 12, kind: output, shape index: {}]  }
   0x1   :  { %18 = vsyncpa [#allocation6], 0 }
   0x2   :  { %19 = vsyncpa [#allocation4], 0  ;;  %s28_s23 = sshll.u32 %s593_s2, 4  ;;  %s472_s24 = smov [#allocation2]   ;;  %s29_s23 = int_to_ptr.hbm [resolvable:$true] %s28_s23 }
   0x3   :  { %s30_s25 = sshll.u32 %s472_s24, 4  ;;  %s55_s28 = sshll.u32 %s601_s10, 4  ;;  %s31_s25 = int_to_ptr.vmem [resolvable:$true] %s30_s25  ;;  %s56_s28 = int_to_ptr.hbm [resolvable:$true] %s55_s28 }
   0x4   :  { %s473_s29 = smov 64   ;;  %s474_s30 = smov 4  }
   0x5   :  { %36 = dma.hbm_to_vmem [thread:$0]  %s29_s23, 256, %s31_s25, [#allocation3], %s473_s29, %s473_s29, %s474_s30  }
   0x6   :  { %s475_s13 = smov [#allocation5]  }
   0x7   :  { %s57_s14 = sshll.u32 %s475_s13, 4  ;;  %s58_s14 = int_to_ptr.vmem [resolvable:$true] %s57_s14 }
   0x8   :  { %63 = dma.hbm_to_vmem [thread:$0]  %s56_s28, 1024, %s58_s14, [#allocation6], %s473_s29, %s473_s29, %s474_s30  }
   0x9   :  { %466 = dma.done.wait [#allocation3], 256  }
   0xa   :  { %467 = vsyncadd [#allocation3], 4294967040 }
   0xb   :  { %468 = dma.done.wait [#allocation6], 1024  }
   0xc   :  { %469 = vsyncadd [#allocation6], 4294966272  ;;  %v476_v0 = vmov 0   ;;  %v477_v1 = vmov 2   ;;  %v145_v2 = vld [vmem:[%s592_s1] sm:$0xff]  ;;  %v358_v3 = vld [vmem:[#allocation2 + $0x8] sm:$0xff] }
   0xd   :  { %376 = vset.pattern.permute.xlu0 %v476_v0  ;;  %378 = vset.pattern.permute.xlu1 %v477_v1  ;;  %v357_v4 = vld [vmem:[#allocation2] sm:$0xff]  ;;  %vm96_vm0 = vcmask 261120   ;;  %v478_v6 = vmov 1   ;;  %v479_v7 = vmov 3   ;;  %v366_v32 = vld [vmem:[#allocation5 + $0x38] sm:$0xff]  ;;  %v364_v34 = vld [vmem:[#allocation5 + $0x28] sm:$0xff] }
   0xe   :  { %150 = vperm.xlu0 %376, %v145_v2   ;;  %167 = vperm.xlu1 %378, %v145_v2   ;;  %v75_v5 = vld [vmem:[%s591_s0] sm:$0xf]  ;;  %v363_v36 = vld [vmem:[#allocation5 + $0x20] sm:$0xff]  ;;  %v362_v37 = vld [vmem:[#allocation5 + $0x18] sm:$0xff] }
   0xf   :  { %106 = vmatpush.bf16.msra.mxu0 %v358_v3  ;;  %v146_v8 = vld [vmem:[%s597_s6] sm:$0xf]  ;;  %283 = vmatpush.bf16.msra.mxu1 %v366_v32  ;;  %v360_v43 = vld [vmem:[#allocation5 + $0x8] sm:$0xff]  ;;  %v359_v47 = vld [vmem:[#allocation5] sm:$0xff] }
  0x10   :  { %v153_v11 = vperm.slane %v146_v8, 0  ;;  %v381_v12 = vld [vmem:[%s598_s7] ss:$0 sm:$0xff]  ;;  %v163_v14 = vperm.slane %v146_v8, 1  ;;  %v170_v15 = vperm.slane %v146_v8, 2  ;;  %v177_v16 = vperm.slane %v146_v8, 3 }
  0x11   :  { %v382_v26 = vld [vmem:[%s594_s3] ss:$0 sm:$0xff] }
  0x12   :  { %v365_v33 = vld [vmem:[#allocation5 + $0x30] sm:$0xff] }
  0x13   :  { %107 = vmatpush.bf16.msra.mxu0 %v357_v4  ;;  %284 = vmatpush.bf16.msra.mxu1 %v365_v33  ;;  %v361_v39 = vld [vmem:[#allocation5 + $0x10] sm:$0xff] }
  0x14   :  { %v383_v4 = vld [vmem:[%s595_s4] ss:$0 sm:$0xff] }
  0x16   :  { %377 = vset.pattern.permute.xlu0 %v478_v6  ;;  %324 = vmatmul.msk.bf16.vlgmr.msra.gmra.mxu0 %vm96_vm0, %v75_v5 }
  0x17   :  { %160 = vperm.xlu0 %377, %v145_v2   ;;  %379 = vset.pattern.permute.xlu1 %v479_v7 }
  0x18   :  { %174 = vperm.xlu1 %379, %v145_v2   ;;  %285 = vmatpush.bf16.msra.mxu1 %v364_v34 }
  0x1c   :  { %286 = vmatpush.bf16.msra.mxu1 %v363_v36 }
  0x1f   :  { %380 = vset.pattern.permute.xlu0 %v479_v7  ;;  %v385_v7 = vld [vmem:[%s599_s8] ss:$0 sm:$0xff] }
  0x20   :  { %287 = vmatpush.bf16.msra.mxu1 %v362_v37 }
  0x24   :  { %288 = vmatpush.bf16.msra.mxu1 %v361_v39 }
  0x28   :  { %289 = vmatpush.bf16.msra.mxu1 %v360_v43 }
  0x2c   :  { %290 = vmatpush.bf16.msra.mxu1 %v359_v47 }
  0x80   :  { %v151_v9 = vpop.permute.xlu0 %150  ;;  %v168_v10 = vpop.permute.xlu1 %167 }
  0x81   :  { %v154_v13 = vmul.f32 %v153_v11, %v151_v9  ;;  %v171_v21 = vmul.f32 %v170_v15, %v168_v10  ;;  %v384_v10 = vld [vmem:[%s596_s5] ss:$0 sm:$0xff]  ;;  %s480_s5 = smov [#allocation7]  }
  0x82   :  { %s303_s26 = sshll.u32 %s480_s5, 4  ;;  %s304_s26 = int_to_ptr.vmem [resolvable:$true] %s303_s26 }
  0x83   :  { %v158_v18 = vadd.f32 %v381_v12, %v154_v13  ;;  %v386_v12 = vld [vmem:[%s600_s9] ss:$0 sm:$0xff]  ;;  %s305_s9 = sshll.u32 %s603_s12, 4  ;;  %s306_s9 = int_to_ptr.hbm [resolvable:$true] %s305_s9 }
  0x89   :  { %v161_v17 = vpop.permute.xlu0 %160 }
  0x8a   :  { %v164_v19 = vmul.f32 %v163_v14, %v161_v17  ;;  %v175_v20 = vpop.permute.xlu1 %174 }
  0x8b   :  { %v178_v23 = vmul.f32 %v177_v16, %v175_v20 }
  0x8c   :  { %v165_v22 = vadd.f32 %v164_v19, %v158_v18  ;;  %v387_v19 = vld [vmem:[%s602_s11] ss:$0 sm:$0xff] }
  0x8e   :  { %v172_v24 = vadd.f32 %v171_v21, %v165_v22 }
  0x90   :  { %v564_v25 = vadd.f32 %v178_v23, %v172_v24 }
  0x92   :  { %182 = vadd.xlane.f32.xlu2 %v564_v25  ;;  %v185_v31 = vmul.f32 %v564_v25, %v564_v25 }
  0x93   :  { %v109_v27 = vpop.f32.mrf.mxu0 }
  0x94   :  { %v110_v28 = vadd.f32 %v382_v26, %v109_v27 }
  0x96   :  { %v118_v29 = vmul.f32 %v110_v28, %v110_v28 }
  0x98   :  { %119 = vadd.xlane.f32.xlu1 %v118_v29 }
  0x9a   :  { %115 = vadd.xlane.f32.xlu2 %v110_v28 }
  0x9b   :  { %v111_v30 = vpop.f32.mrf.mxu0 }
  0xa2   :  { %186 = vadd.xlane.f32.xlu2 %v185_v31 }
 0x105   :  { %v183_v35 = vpop.xlane.xlu2 %182 }
 0x106   :  { %v184_v45 = vmul.f32 0.03125, %v183_v35 }
 0x108   :  { %v189_v50 = vmul.f32 %v184_v45, %v184_v45  ;;  %v191_v6 = vsub.f32 %v564_v25, %v184_v45 }
 0x10b   :  { %v120_v38 = vpop.xlane.xlu1 %119 }
 0x10c   :  { %v121_v42 = vmul.f32 0.03125, %v120_v38 }
 0x10d   :  { %v116_v40 = vpop.xlane.xlu2 %115 }
 0x10e   :  { %v117_v41 = vmul.f32 0.03125, %v116_v40 }
 0x110   :  { %v122_v44 = vmul.f32 %v117_v41, %v117_v41  ;;  %v124_v1 = vsub.f32 %v110_v28, %v117_v41 }
 0x112   :  { %v123_v46 = vsub.f32 %v121_v42, %v122_v44 }
 0x114   :  { %v125_v48 = vadd.f32 1e-12, %v123_v46 }
 0x115   :  { %v187_v49 = vpop.xlane.xlu2 %186 }
 0x116   :  { %388 = vrsqrt.f32 %v125_v48  ;;  %v188_v51 = vmul.f32 0.03125, %v187_v49  ;;  %vm132_vm2 = vweird.f32 %v125_v48 }
 0x118   :  { %v190_v52 = vsub.f32 %v188_v51, %v189_v50 }
 0x11a   :  { %v192_v53 = vadd.f32 1e-12, %v190_v52 }
 0x11c   :  { %v389_v54 = vpop.eup %388  ;;  %390 = vrsqrt.f32 %v192_v53  ;;  %vm199_vm5 = vweird.f32 %v192_v53 }
 0x11d   :  { %v127_v55 = vmul.f32 %v389_v54, %v125_v48  ;;  %vm133_vm1 = vweird.f32 %v389_v54 }
 0x11e   :  { %vm134_vm3 = vmor %vm132_vm2, %vm133_vm1 }
 0x11f   :  { %v128_v56 = vmul.f32 %v389_v54, %v127_v55 }
 0x121   :  { %v129_v57 = vmul.f32 0.5, %v128_v56 }
 0x122   :  { %v391_v58 = vpop.eup %390 }
 0x123   :  { %v130_v59 = vsub.f32 1.5, %v129_v57  ;;  %v194_v60 = vmul.f32 %v391_v58, %v192_v53  ;;  %vm200_vm4 = vweird.f32 %v391_v58 }
 0x124   :  { %vm201_vm6 = vmor %vm199_vm5, %vm200_vm4 }
 0x125   :  { %v131_v61 = vmul.f32 %v389_v54, %v130_v59  ;;  %v195_v62 = vmul.f32 %v391_v58, %v194_v60 }
 0x127   :  { %v196_v63 = vmul.f32 0.5, %v195_v62  ;;  %v135_v0 = vsel %vm134_vm3, %v389_v54, %v131_v61 }
 0x128   :  { %v136_v3 = vmul.f32 %v135_v0, %v124_v1 }
 0x129   :  { %v197_v2 = vsub.f32 1.5, %v196_v63 }
 0x12a   :  { %v140_v9 = vmul.f32 %v383_v4, %v136_v3 }
 0x12b   :  { %v198_v5 = vmul.f32 %v391_v58, %v197_v2 }
 0x12c   :  { %v144_v14 = vadd.f32 %v384_v10, %v140_v9 }
 0x12d   :  { %v202_v8 = vsel %vm201_vm6, %v391_v58, %v198_v5 }
 0x12e   :  { %v203_v11 = vmul.f32 %v202_v8, %v191_v6 }
 0x130   :  { %v207_v13 = vmul.f32 %v385_v7, %v203_v11 }
 0x132   :  { %v211_v15 = vadd.f32 %v386_v12, %v207_v13 }
 0x134   :  { %v212_v16 = vadd.f32 %v211_v15, %v144_v14 }
 0x136   :  { %v213_v17 = vmul.f32 0.5, %v212_v16 }
 0x138   :  { %v214_v18 = vpack.c.bf16 %v213_v17, %v213_v17 }
 0x13a   :  { %291 = vmatmul.bf16.vlgmr.msra.gmra.mxu1 %v214_v18 }
 0x1b7   :  { %v292_v20 = vpop.f32.mrf.mxu1 }
 0x1b8   :  { %v293_v21 = vadd.f32 %v387_v19, %v292_v20 }
 0x1ba   :  { %392 = vtanh.f32 %v293_v21 }
 0x1bf   :  { %v294_v22 = vpop.f32.mrf.mxu1 }
 0x1c0   :  { %v393_v23 = vpop.eup %392 }
 0x1c1   :  { %297 = vst [vmem:[#allocation7] sm:$0xff] %v393_v23 }
 0x1c2   :  { %308 = dma.vmem_to_hbm [thread:$0]  %s304_s26, 128, %s306_s9, [#allocation4]  }
 0x1c3   :  { %470 = dma.done.wait [#allocation4], 128  }
 0x1c4   :  { %471 = vsyncadd [#allocation4], 4294967168 }
 0x1c5   :  { %313 = vsyncpa [#allocation3], 1 }
 0x1c6   :  { %314 = vsyncpa [#allocation6], 1 }
 0x1c7   :  { %315 = vsyncpa [#allocation4], 1 }

</bundles_post_ra>
